<compile_context>
chip_gen: v5e
topology: v5e:2x2
jax: 0.10.0
libtpu: 0.0.40
codegen_flags: <defaults>
</compile_context>

<pallas_src>
import functools

import jax
import jax.numpy as jnp
import numpy as np
from jax import lax
from jax.experimental import pallas as pl
from jax.experimental.pallas import tpu as pltpu


def _round_up(x, m):
    return (x + m - 1) // m * m


# ---------------------------------------------------------------------------
# Generic tiled GEMM + bias:  (M, K) @ (K, N) + b   with a parallel grid.
# Used for both the batched input projection and the vocab projection.
# ---------------------------------------------------------------------------
def _matmul_bias_kernel(x_ref, w_ref, b_ref, o_ref):
    o_ref[...] = (
        jnp.dot(x_ref[...], w_ref[...], preferred_element_type=jnp.float32)
        + b_ref[...]
    ).astype(o_ref.dtype)


def matmul_bias(x, w, b, *, bn=128):
    """x: (M, K), w: (K, N), b: (1, N).  M % 8 == 0, N % bn == 0."""
    M, K = x.shape
    Kw, N = w.shape
    assert K == Kw and b.shape == (1, N)
    assert M % 8 == 0 and N % bn == 0
    bm = 128 if M % 128 == 0 else M          # small M -> single full-M block
    grid = (M // bm, N // bn)
    return pl.pallas_call(
        _matmul_bias_kernel,
        out_shape=jax.ShapeDtypeStruct((M, N), jnp.float32),
        grid_spec=pltpu.PrefetchScalarGridSpec(
            num_scalar_prefetch=0,
            grid=grid,
            in_specs=[
                pl.BlockSpec((bm, K), lambda i, j: (i, 0)),
                pl.BlockSpec((K, bn), lambda i, j: (0, j)),
                pl.BlockSpec((1, bn), lambda i, j: (0, j)),
            ],
            out_specs=pl.BlockSpec((bm, bn), lambda i, j: (i, j)),
        ),
        compiler_params=pltpu.CompilerParams(
            dimension_semantics=("parallel", "parallel")),
    )(x, w, b)


# ---------------------------------------------------------------------------
# Sequential LSTM recurrence.  Input projection already hoisted out, so each
# step is only h @ W_hh + gates_in[t] + gate nonlinearities.  Tb time steps
# per grid invocation; h/c live in VMEM scratch across the time grid axis.
# ---------------------------------------------------------------------------
def _lstm_recurrence_kernel(gin_ref, whh_ref, h_out_ref, h_ref, c_ref, *, tb, hp):
    """gin_ref : (Tb, Bp, 4*Hp)  precomputed x@W_ih + b for this time block
       whh_ref : (Hp, 4*Hp)      hidden->gates weights (transposed, gate-padded)
       h_out_ref: (Tb, Bp, Hp)   per-step hidden states (lane-dense stores)
       h_ref, c_ref: (Bp, Hp)    carries across the sequential time grid axis
    """
    blk = pl.program_id(0)

    @pl.when(blk == 0)
    def _():
        h_ref[...] = jnp.zeros_like(h_ref)
        c_ref[...] = jnp.zeros_like(c_ref)

    def step(tt, carry):
        h, c = carry
        gates = gin_ref[tt] + jnp.dot(
            h, whh_ref[...], preferred_element_type=jnp.float32)  # (Bp, 4Hp)
        # PyTorch LSTM gate order: input, forget, cell(g), output.
        # Hp is a multiple of 128 -> all slices are lane-tile aligned (free views).
        i_g = jax.nn.sigmoid(gates[:, 0 * hp:1 * hp])
        f_g = jax.nn.sigmoid(gates[:, 1 * hp:2 * hp])
        g_g = jnp.tanh(gates[:, 2 * hp:3 * hp])
        o_g = jax.nn.sigmoid(gates[:, 3 * hp:4 * hp])
        c_new = f_g * c + i_g * g_g
        h_new = o_g * jnp.tanh(c_new)
        h_out_ref[tt] = h_new
        return h_new, c_new

    h, c = lax.fori_loop(0, tb, step, (h_ref[...], c_ref[...]), unroll=True)
    h_ref[...] = h
    c_ref[...] = c


def lstm_recurrence(gates_in, w_hh, *, tb=8):
    """gates_in: (Tp, Bp, 4*Hp), w_hh: (Hp, 4*Hp).  Returns h_all (Tp, Bp, Hp)."""
    Tp, Bp, H4 = gates_in.shape
    Hp = w_hh.shape[0]
    assert H4 == 4 * Hp and Tp % tb == 0
    kernel = functools.partial(_lstm_recurrence_kernel, tb=tb, hp=Hp)
    return pl.pallas_call(
        kernel,
        out_shape=jax.ShapeDtypeStruct((Tp, Bp, Hp), jnp.float32),
        grid_spec=pltpu.PrefetchScalarGridSpec(
            num_scalar_prefetch=0,
            grid=(Tp // tb,),
            in_specs=[
                pl.BlockSpec((tb, Bp, H4), lambda t: (t, 0, 0)),  # gates block
                pl.BlockSpec((Hp, H4), lambda t: (0, 0)),         # W_hh resident
            ],
            out_specs=pl.BlockSpec((tb, Bp, Hp), lambda t: (t, 0, 0)),
            scratch_shapes=[
                pltpu.VMEM((Bp, Hp), jnp.float32),   # h carry
                pltpu.VMEM((Bp, Hp), jnp.float32),   # c carry
            ],
        ),
        compiler_params=pltpu.CompilerParams(
            # time axis is a recurrence -> must stay sequential
            dimension_semantics=("arbitrary",)),
    )(gates_in, w_hh)


# ---------------------------------------------------------------------------
# Weight padding helpers: each gate's H columns are padded to Hp so gate
# boundaries land on 128-lane tiles; zero padding is exact (padded h/c stay 0).
# ---------------------------------------------------------------------------
def _pad_gate_cols(w, h, hp):
    if h == hp:
        return w
    parts = jnp.split(w, 4, axis=-1)
    pad = [(0, 0)] * (w.ndim - 1) + [(0, hp - h)]
    return jnp.concatenate([jnp.pad(p, pad) for p in parts], axis=-1)


# ---------------------------------------------------------------------------
# Forward pass (mirror of DecoderRNN.forward)
# ---------------------------------------------------------------------------
def decoder_rnn_forward(params, features, captions, *, tb=8):
    """features: (B, E) f32, captions: (B, L) int32 -> logits (B, L, V) f32."""
    B, E = features.shape
    L = captions.shape[1]
    T = L                                    # (L-1) caption tokens + 1 feature step
    H = params["w_hh"].shape[0]
    V = params["w_out"].shape[1]

    Bp = _round_up(B, 8)
    Hp = _round_up(H, 128)
    Vp = _round_up(V, 128)
    tb = min(tb, _round_up(T, 1))
    Tp = _round_up(T, tb)

    # --- glue: embedding gather + concat (plain JAX) ---
    emb = jnp.take(params["embed"], captions[:, :-1], axis=0)     # (B, L-1, E)
    x = jnp.concatenate([features[:, None, :], emb], axis=1)      # (B, T, E)
    x = jnp.transpose(x, (1, 0, 2)).astype(jnp.float32)           # (T, B, E)
    x = jnp.pad(x, ((0, Tp - T), (0, Bp - B), (0, 0)))            # (Tp, Bp, E)

    # --- pad weights to lane-aligned shapes ---
    w_ih = _pad_gate_cols(params["w_ih"], H, Hp)                              # (E, 4Hp)
    w_hh = _pad_gate_cols(jnp.pad(params["w_hh"], ((0, Hp - H), (0, 0))), H, Hp)  # (Hp, 4Hp)
    b_lstm = _pad_gate_cols(params["b_lstm"], H, Hp)                          # (1, 4Hp)
    w_out = jnp.pad(params["w_out"], ((0, Hp - H), (0, Vp - V)))              # (Hp, Vp)
    b_out = jnp.pad(params["b_out"], ((0, 0), (0, Vp - V)))                   # (1, Vp)

    # --- Stage 1: batched input projection, one parallel GEMM over all steps ---
    gates_in = matmul_bias(x.reshape(Tp * Bp, E), w_ih, b_lstm)   # (Tp*Bp, 4Hp)
    gates_in = gates_in.reshape(Tp, Bp, 4 * Hp)

    # --- Stage 2: sequential recurrence (h @ W_hh + elementwise only) ---
    h_all = lstm_recurrence(gates_in, w_hh, tb=tb)                # (Tp, Bp, Hp)

    # --- Stage 3: batched vocab projection, one parallel GEMM over all steps ---
    logits = matmul_bias(h_all.reshape(Tp * Bp, Hp), w_out, b_out)
    logits = logits.reshape(Tp, Bp, Vp)[:T, :B, :V]               # (T, B, V)

    # TODO(synk): for realistic T*B*V a downstream consumer should take the
    # time-major logits directly to avoid this extra full-tensor HBM transpose.
    return jnp.transpose(logits, (1, 0, 2))                       # (B, T, V)


# ---------------------------------------------------------------------------
# Pure-JAX reference (lax.scan) for correctness checking.
# ---------------------------------------------------------------------------
def decoder_rnn_reference(params, features, captions):
    emb = jnp.take(params["embed"], captions[:, :-1], axis=0)
    x = jnp.concatenate([features[:, None, :], emb], axis=1)      # (B, T, E)
    B = x.shape[0]
    H = params["w_hh"].shape[0]

    def step(carry, xt):
        h, c = carry
        gates = xt @ params["w_ih"] + h @ params["w_hh"] + params["b_lstm"][0]
        i, f, g, o = jnp.split(gates, 4, axis=-1)
        i = jax.nn.sigmoid(i)
        f = jax.nn.sigmoid(f)
        g = jnp.tanh(g)
        o = jax.nn.sigmoid(o)
        c = f * c + i * g
        h = o * jnp.tanh(c)
        return (h, c), h

    h0 = jnp.zeros((B, H), jnp.float32)
    c0 = jnp.zeros((B, H), jnp.float32)
    _, hs = jax.lax.scan(step, (h0, c0), jnp.transpose(x, (1, 0, 2)))
    out = hs @ params["w_out"] + params["b_out"][0]               # (T, B, V)
    return jnp.transpose(out, (1, 0, 2))


def init_params(key, embed_size, hidden_size, vocab_size):
    ks = jax.random.split(key, 7)
    s = 0.1
    return {
        "embed": s * jax.random.normal(ks[0], (vocab_size, embed_size), jnp.float32),
        # stored transposed relative to PyTorch (so kernels do x @ W)
        "w_ih": s * jax.random.normal(ks[1], (embed_size, 4 * hidden_size), jnp.float32),
        "w_hh": s * jax.random.normal(ks[2], (hidden_size, 4 * hidden_size), jnp.float32),
        # combined bias (PyTorch's b_ih + b_hh), kept 2-D for clean VMEM layout
        "b_lstm": s * jax.random.normal(ks[3], (1, 4 * hidden_size), jnp.float32),
        "w_out": s * jax.random.normal(ks[4], (hidden_size, vocab_size), jnp.float32),
        "b_out": s * jax.random.normal(ks[5], (1, vocab_size), jnp.float32),
    }


if __name__ == "__main__":
    # TODO(synk): the autoregressive `sample()` method (data-dependent loop with
    # early stop on token==1) is host-driven control flow and is not implemented
    # as a kernel; only forward() is.
    embed_size, hidden_size, vocab_size = 16, 32, 40
    B, caption_len = 2, 8  # -> T = 8 time steps (features + 7 caption tokens)

    key = jax.random.PRNGKey(0)
    kp, kf, kc = jax.random.split(key, 3)
    params = init_params(kp, embed_size, hidden_size, vocab_size)

    features = jax.random.normal(kf, (B, embed_size), jnp.float32)
    captions = jax.random.randint(kc, (B, caption_len), 0, vocab_size, jnp.int32)

    out = decoder_rnn_forward(params, features, captions)
    out = jax.block_until_ready(out)

    ref = jax.block_until_ready(decoder_rnn_reference(params, features, captions))

    assert out.shape == (B, caption_len, vocab_size), out.shape
    np.testing.assert_allclose(np.asarray(out), np.asarray(ref), rtol=1e-5, atol=1e-5)

    print("KERNEL_OK")
</pallas_src>

<mosaic_0001>
module attributes {stable_mosaic.version = 11 : i64} {
  func.func @_matmul_bias_kernel(%arg0: i32, %arg1: i32, %arg2: memref<64x16xf32, #tpu.memory_space<vmem>>, %arg3: memref<16x128xf32, #tpu.memory_space<vmem>>, %arg4: memref<1x128xf32, #tpu.memory_space<vmem>>, %arg5: memref<64x128xf32, #tpu.memory_space<vmem>>) attributes {dimension_semantics = [#tpu.dimension_semantics<parallel>, #tpu.dimension_semantics<parallel>], iteration_bounds = array<i64: 1, 4>, scalar_prefetch = 0 : i64, scratch_operands = 0 : i64, tpu.core_type = #tpu.core_type<tc>, window_params = [{transform_indices = @transform_0, window_bounds = array<i64: 64, 16>}, {transform_indices = @transform_1, window_bounds = array<i64: 16, 128>}, {transform_indices = @transform_2, window_bounds = array<i64: 1, 128>}, {transform_indices = @transform_3, window_bounds = array<i64: 64, 128>}]} {
    %c0 = arith.constant 0 : index
    %c0_0 = arith.constant 0 : index
    %0 = vector.load %arg2[%c0, %c0_0] : memref<64x16xf32, #tpu.memory_space<vmem>>, vector<64x16xf32>
    %c0_1 = arith.constant 0 : index
    %c0_2 = arith.constant 0 : index
    %1 = vector.load %arg3[%c0_1, %c0_2] : memref<16x128xf32, #tpu.memory_space<vmem>>, vector<16x128xf32>
    %cst = arith.constant dense<0.000000e+00> : vector<64x128xf32>
    %2 = tpu.matmul %0, %1, %cst {dimension_numbers = #tpu.dot_dimension_numbers<[1], [0], [0], [1], [0, 0, 1, 1], [], []>} : vector<64x16xf32>, vector<16x128xf32>, vector<64x128xf32> -> vector<64x128xf32>
    %c0_3 = arith.constant 0 : index
    %c0_4 = arith.constant 0 : index
    %3 = vector.load %arg4[%c0_3, %c0_4] : memref<1x128xf32, #tpu.memory_space<vmem>>, vector<1x128xf32>
    %4 = vector.broadcast %3 : vector<1x128xf32> to vector<64x128xf32>
    %5 = arith.addf %2, %4 : vector<64x128xf32>
    %c0_5 = arith.constant 0 : index
    %c0_6 = arith.constant 0 : index
    %6 = vector.load %arg5[%c0_5, %c0_6] : memref<64x128xf32, #tpu.memory_space<vmem>>, vector<64x128xf32>
    tpu.vector_store %arg5[%c0_5, %c0_6], %5 {strides = array<i32>} : memref<64x128xf32, #tpu.memory_space<vmem>>, vector<64x128xf32>,
    return
  }
  func.func @transform_0(%arg0: i32, %arg1: i32) -> (i32, i32) {
    %c0_i32 = arith.constant 0 : i32
    %c0_i32_0 = arith.constant 0 : i32
    return %arg0, %c0_i32 : i32, i32
  }
  func.func @transform_1(%arg0: i32, %arg1: i32) -> (i32, i32) {
    %c0_i32 = arith.constant 0 : i32
    %c0_i32_0 = arith.constant 0 : i32
    return %c0_i32, %arg1 : i32, i32
  }
  func.func @transform_2(%arg0: i32, %arg1: i32) -> (i32, i32) {
    %c0_i32 = arith.constant 0 : i32
    %c0_i32_0 = arith.constant 0 : i32
    return %c0_i32, %arg1 : i32, i32
  }
  func.func @transform_3(%arg0: i32, %arg1: i32) -> (i32, i32) {
    %c0_i32 = arith.constant 0 : i32
    return %arg0, %arg1 : i32, i32
  }
}

</mosaic_0001>

<bundles_post_ra>
// kernel: tpu_custom_call.1
= control target key start
LH: loop header
LB: loop body
LE: loop exit
PB: predicated region body
PF: predicated region fallthrough
CT: control target
= control target key end

     0   :  { %8 = vsyncpa [#allocation4], 0  ;;  %s801_s0 = inlined_call_operand.vmem [shape: f32[64,16], index: 0, kind: input, shape index: {}]   ;;  %s802_s1 = inlined_call_operand.vmem [shape: f32[16,512], index: 1, kind: input, shape index: {}]   ;;  %s803_s2 = inlined_call_operand.vmem [shape: f32[1,512], index: 2, kind: input, shape index: {}]   ;;  %s804_s3 = inlined_call_operand.hbm [shape: f32[64,512], index: 3, kind: output, shape index: {}]  }
   0x1   :  { %10 = vsyncpa [#allocation4 + $0x1], 0  ;;  %s657_s12 = smov 0   ;;  %s659_s13 = smov 0  }
   0x2   :  { %s661_s14 = smov 0   ;;  %s663_s15 = smov 0  }
   0x3   :  { %s665_s16 = smov 0   ;;  %s667_s17 = smov 0  }
   0x4 LB: > { %s467_s18 = sadd.s32 4294967295, %s632_s17   ;;  %s468_s19 = sadd.s32 4294967294, %s632_s17   ;;  %s632_s17 = sphi %s667_s17, %s16_s17   ;;  %s628_s16 = sphi %s665_s16, %s811_s16   ;;  %s624_s15 = sphi %s663_s15, %s810_s15   ;;  %s620_s14 = sphi %s661_s14, %s809_s14   ;;  %s616_s13 = sphi %s659_s13, %s808_s13   ;;  %s612_s12 = sphi %s657_s12, %s807_s12  }
   0x5   : > { %s25_s20 = sadd.s32 1, %s628_s16  ;;  %s61_s21 = sadd.s32 1, %s620_s14 }
   0x6   : > { %p26_p0 = scmp.ge.s32.totalorder %s25_s20, 4  ;;  %p68_p1 = scmp.ne.s32.totalorder %s620_s14, %s616_s13 }
   0x7   : > { %p69_p2 = scmp.eq.s32.totalorder %s632_s17, 0  ;;  %p126_p3 = scmp.eq.s32.totalorder %s467_s18, 3 }
   0x8   : > { %s813_s20 = smov (%p26_p0, %s25_s20), 0  ;;  %p131_p6 = scmp.ne.s32.totalorder %s616_s13, %s612_s12 }
   0x9   : > { %p70_p4 = por %p69_p2, %p68_p1  ;;  %p696_p5 = por %p126_p3, %p68_p1 }
   0xa   : > { %s58_s23 = ssub.s32 %s628_s16, %s813_s20  ;;  %p132_p8 = scmp.eq.s32.totalorder %s468_s19, 3 }
   0xb   : > { %p59_p7 = scmp.eq.s32.totalorder %s58_s23, 0  ;;  %p471_p10 = scmp.ge.s32.totalorder %s632_s17, 4 }
   0xc   : > { %p707_p9 = por %p132_p8, %p131_p6 }
   0xd   : > { %s705_s24 = scalar_select %p59_p7, %s620_s14, %s61_s21  }
   0xe   : > { %157 = sbr.rel (%p471_p10) target bundleno = 25 (0x19), region = 20 }
  0x13   : > { %160 = sbr.rel (!%p70_p4) target bundleno = 25 (0x19), region = 24  ;;  %s162_s26 = sand.u32 (%p70_p4), 1, %s620_s14  }
  0x14   : > { %s473_s27 = sshll.u32 (%p70_p4), %s628_s16, 3  ;;  %s472_s28 = sshll.u32 (%p70_p4), %s162_s26, 4 }
  0x15   : > { %s166_s4 = scalar_lea.vmem (%p70_p4), %s802_s1, %s473_s27  ;;  %s164_s5 = scalar_lea.vmem (%p70_p4), [#allocation2], %s472_s28 }
  0x16   : > { %v197_v0 = vld [vmem:[%s166_s4] sm:$0xff] (%p70_p4) }
  0x17   : > { %v199_v1 = vld [vmem:[%s166_s4 + $0x20] sm:$0xff] (%p70_p4)  ;;  %198 = vst [vmem:[%s164_s5] sm:$0xff] (%p70_p4), %v197_v0 }
  0x18   : > { %200 = vst [vmem:[%s164_s5 + $0x8] sm:$0xff] %v199_v1 }
  0x19 PF: > { %p474_p11 = scmp.ge.s32.totalorder %s632_s17, 1  ;;  %p211_p12 = scmp.lt.s32.totalorder %s632_s17, 5 }
  0x1b   : > { %p212_p13 = pnand %p474_p11, %p211_p12 }
  0x1c   : > { %s720_s6 = sand.u32 (!%p212_p13), 1, %s616_s13   ;;  %p255_p0 = scmp.lt.s32.totalorder (!%p212_p13), %s624_s15, 3 }
  0x1d   : > { %215 = sbr.rel (%p212_p13) target bundleno = 186 (0xba), region = 66  ;;  %s475_s7 = sshll.u32 (!%p212_p13), %s720_s6, 4 }
  0x1e   : > { %s220_s8 = scalar_lea.vmem (!%p212_p13), [#allocation2], %s475_s7  ;;  %s486_s23 = sshll.u32 (!%p212_p13), %s624_s15, 3 }
  0x1f   : > { %s361_s28 = scalar_lea.hbm (!%p212_p13), %s804_s3, %s486_s23  ;;  %s574_s9 = scalar_lea.hbm (!%p212_p13), %s804_s3, 256 }
  0x22   : > { %v268_v2 = vld [vmem:[%s220_s8 + $0x8] sm:$0xff]  ;;  %v267_v3 = vld [vmem:[%s220_s8] sm:$0xff]  ;;  %vm273_vm0 = vcmask 130048   ;;  %s256_s19 = scalar_select %p255_p0, %s624_s15, 3 }
  0x23   : > { %490 = vmatpush.msra.mxu2 %v268_v2  ;;  %491 = vmatpush.msra.mxu3 %v268_v2  ;;  %v263_v4 = vld [vmem:[%s801_s0 + $0x20] sm:$0xff]  ;;  %v265_v5 = vld [vmem:[%s801_s0 + $0x30] sm:$0xff]  ;;  %v264_v8 = vld [vmem:[%s801_s0 + $0x28] sm:$0xff]  ;;  %s348_s15 = scalar_lea.sflag [#allocation4], %s720_s6 }
  0x24   : > { %312 = vmatpush.msra.mxu0 %v268_v2  ;;  %489 = vmatpush.msra.mxu1 %v268_v2  ;;  %v259_v6 = vld [vmem:[%s801_s0] sm:$0xff]  ;;  %v261_v7 = vld [vmem:[%s801_s0 + $0x10] sm:$0xff]  ;;  %s257_s30 = scalar_lea.vmem %s803_s2, %s256_s19  ;;  %v266_v9 = vld [vmem:[%s801_s0 + $0x38] sm:$0xff]  ;;  %s476_s19 = sshll.u32 %s720_s6, 6 }
  0x25   : > { %493 = vmatpush.msra.mxu2 %v267_v3  ;;  %494 = vmatpush.msra.mxu3 %v267_v3  ;;  %v260_v10 = vld [vmem:[%s801_s0 + $0x8] sm:$0xff]  ;;  %v262_v11 = vld [vmem:[%s801_s0 + $0x18] sm:$0xff]  ;;  %v553_v12 = vld [vmem:[%s257_s30] ss:$0 sm:$0xff]  ;;  %s248_s21 = scalar_lea.vmem [#allocation3], %s476_s19  ;;  %s364_s30 = sshll.u32 %s361_s28, 4  ;;  %s365_s30 = int_to_ptr.hbm [resolvable:$true] %s364_s30 }
  0x26   : > { %481 = vmatmul.msk.f32.vlgmr.msra.gmra.mxu2 %vm273_vm0, %v263_v4  ;;  %483 = vmatmul.msk.f32.vlgmr.msra.gmra.mxu3 %vm273_vm0, %v265_v5  ;;  %s362_s29 = sshll.u32 %s248_s21, 4  ;;  %s568_s4 = sshra.s32 %s365_s30, 4  ;;  %s765_s29 = int_to_ptr.vmem [resolvable:$true] %s362_s29  ;;  %s569_s4 = int_to_ptr.hbm [resolvable:$true] %s568_s4 }
  0x27   : > { %313 = vmatpush.msra.mxu0 %v267_v3  ;;  %492 = vmatpush.msra.mxu1 %v267_v3  ;;  %s570_s5 = scalar_lea.hbm %s569_s4, 64  ;;  %p575_p4 = scmp.lt.s32.totalorder %s569_s4, %s804_s3 }
  0x28   : > { %477 = vmatmul.msk.f32.vlgmr.msra.gmra.mxu0 %vm273_vm0, %v259_v6  ;;  %479 = vmatmul.msk.f32.vlgmr.msra.gmra.mxu1 %vm273_vm0, %v261_v7  ;;  %p571_p1 = scmp.ne.s32.totalorder %s569_s4, %s570_s5  ;;  %p576_p6 = scmp.lt.s32.totalorder %s574_s9, %s570_s5 }
  0x2a   : > { %p572_p2 = pnand %p571_p1, %p696_p5  ;;  %p577_p7 = por %p576_p6, %p575_p4 }
  0x2c   : > { %p573_p3 = pneg %p572_p2 }
  0x2e   : > { %482 = vmatmul.msk.f32.gmra.mxu2 %vm273_vm0, %v264_v8  ;;  %484 = vmatmul.msk.f32.gmra.mxu3 %vm273_vm0, %v266_v9  ;;  %p578_p8 = pnand %p577_p7, %p573_p3 }
  0x30   : > { %478 = vmatmul.msk.f32.gmra.mxu0 %vm273_vm0, %v260_v10  ;;  %480 = vmatmul.msk.f32.gmra.mxu1 %vm273_vm0, %v262_v11 }
  0xa5   : > { %v315_v13 = vpop.f32.mrf.mxu0  ;;  %v321_v14 = vpop.f32.mrf.mxu1 }
  0xa6   : > { %v316_v15 = vadd.f32 %v553_v12, %v315_v13  ;;  %v322_v16 = vadd.f32 %v553_v12, %v321_v14 }
  0xa8   : > { %339 = vst [vmem:[%s248_s21] sm:$0xff] %v316_v15 }
  0xa9   : > { %341 = vst [vmem:[%s248_s21 + $0x10] sm:$0xff] %v322_v16  ;;  %v327_v17 = vpop.f32.mrf.mxu2  ;;  %v333_v18 = vpop.f32.mrf.mxu3 }
  0xaa   : > { %v328_v19 = vadd.f32 %v553_v12, %v327_v17  ;;  %v334_v20 = vadd.f32 %v553_v12, %v333_v18 }
  0xac   : > { %343 = vst [vmem:[%s248_s21 + $0x20] sm:$0xff] %v328_v19 }
  0xad   : > { %345 = vst [vmem:[%s248_s21 + $0x30] sm:$0xff] %v334_v20  ;;  %v318_v21 = vpop.f32.mrf.mxu0  ;;  %v324_v22 = vpop.f32.mrf.mxu1 }
  0xae   : > { %v319_v23 = vadd.f32 %v553_v12, %v318_v21  ;;  %v325_v24 = vadd.f32 %v553_v12, %v324_v22 }
  0xb0   : > { %340 = vst [vmem:[%s248_s21 + $0x8] sm:$0xff] %v319_v23 }
  0xb1   : > { %342 = vst [vmem:[%s248_s21 + $0x18] sm:$0xff] %v325_v24  ;;  %v330_v25 = vpop.f32.mrf.mxu2  ;;  %v336_v26 = vpop.f32.mrf.mxu3 }
  0xb2   : > { %v331_v27 = vadd.f32 %v553_v12, %v330_v25  ;;  %v337_v28 = vadd.f32 %v553_v12, %v336_v26 }
  0xb4   : > { %344 = vst [vmem:[%s248_s21 + $0x28] sm:$0xff] %v331_v27 }
  0xb5   : > { %346 = vst [vmem:[%s248_s21 + $0x38] sm:$0xff] %v337_v28 }
  0xb6   : > { %581 = shalt.err (!%p578_p8)
}
  0xb7   : > { %s634_s6 = smov 128   ;;  %s635_s18 = smov 512  }
  0xb8   : > { %s636_s19 = smov 8  }
  0xb9   : > { %495 = dma.vmem_to_hbm [thread:$0]  (%p696_p5), %s765_s29, 1024, %s365_s30, %s348_s15, %s634_s6, %s635_s18, %s636_s19  }
  0xba PF: > { %p501_p10 = scmp.ge.s32.totalorder %s632_s17, 2  ;;  %s379_s21 = sand.u32 1, %s612_s12  }
  0xbb   : > { %s380_s23 = scalar_lea.sflag [#allocation4], %s379_s21 }
  0xbc   : > { %p498_p11 = pnand %p501_p10, %p707_p9 }
  0xbe   : > { %p499_p12 = pneg %p498_p11 }
  0xc0   : > { %607 = dma.done.wait (%p499_p12), %s380_s23, 1024  }
  0xc1   : > { %609 = vsyncadd (%p499_p12), %s380_s23, 4294966272  ;;  %s16_s17 = sadd.s32 1, %s632_s17   ;;  %s807_s12 = smov %s616_s13 }
  0xc2   : > { %p13_p13 = scmp.ge.s32.totalorder %s16_s17, 6   ;;  %s808_s13 = smov %s620_s14 }
  0xc3   : > { %s809_s14 = smov %s705_s24  ;;  %s810_s15 = smov %s628_s16 }
  0xc4   : > { %s811_s16 = smov %s813_s20  ;;  %15 = sbr.rel (!%p13_p13) target bundleno = 4 (0x4), region = 116 }
  0xc9   :  { %386 = vsyncpa [#allocation4], 1 }
  0xca   :  { %388 = vsyncpa [#allocation4 + $0x1], 1 }

</bundles_post_ra>
